<compile_context>
chip_gen: v7x
topology: tpu7x:2x2x1
jax: 0.10.0
libtpu: 0.0.40
codegen_flags: <defaults>
</compile_context>

<pallas_src>
import functools

import jax
import jax.numpy as jnp
from jax.experimental import pallas as pl
from jax.experimental.pallas import tpu as pltpu


def dc_crossen_kernel(sim0_ref, sim1_ref, d0row_ref, d1row_ref, d0col_ref,
                      out_ref, *, seta):
    sim0 = sim0_ref[...].astype(jnp.float32)      # (TM, N)
    sim1 = sim1_ref[...].astype(jnp.float32)      # (TM, N)
    d0_row = d0row_ref[...].astype(jnp.float32)   # (1, N)  column-wise broadcast
    d1_row = d1row_ref[...].astype(jnp.float32)   # (1, N)
    d0_col = d0col_ref[...].astype(jnp.float32)   # (TM, 1) per-row diagonal entry

    s0 = sim0 - d0_row
    s1 = sim1 - d1_row
    sim = jnp.where(s1 < jnp.float32(seta), s0, jnp.float32(0.0)) + d0_row

    # Numerically stable row-wise logsumexp.
    m = jnp.max(sim, axis=-1, keepdims=True)                              # (TM, 1)
    lse = jnp.log(jnp.sum(jnp.exp(sim - m), axis=-1, keepdims=True)) + m  # (TM, 1)

    # NOTE: sim[i, i] == diag0[i] for ANY seta, because on the diagonal both
    # branches of the `where` above are exactly 0 (s0[i,i] = s1[i,i] = 0).
    # Hence -diag(log_softmax(sim))[i] = lse[i] - diag0[i].  If the masking
    # rule ever changes, this identity must be re-checked.
    out_ref[...] = lse - d0_col


def _pick_row_tile(n, itemsize, budget_bytes=12 * 1024 * 1024):
    """Largest row tile (divisor of n, multiple of 8) whose double-buffered
    inputs (2 matrices x 2 pipeline buffers x TM x N) fit the VMEM budget."""
    for tm in (1024, 512, 256, 128, 64, 32, 16, 8):
        if n % tm == 0 and 4 * tm * n * itemsize <= budget_bytes:
            return tm
    return n  # fallback: whole matrix in one block (small / odd n only)


def dc_crossen(sim_matrix0, sim_matrix1, seta=0.8):
    assert sim_matrix0.shape == sim_matrix1.shape
    assert sim_matrix0.ndim == 2 and sim_matrix0.shape[0] == sim_matrix0.shape[1]
    n = sim_matrix0.shape[0]

    # Hoist diagonal extraction out of the kernel (prerequisite for row tiling:
    # every row tile needs the FULL diag vectors for the column-wise broadcast).
    diag0 = jnp.diagonal(sim_matrix0)
    diag1 = jnp.diagonal(sim_matrix1)
    d0_row = diag0.reshape(1, n)
    d1_row = diag1.reshape(1, n)
    d0_col = diag0.reshape(n, 1)

    tm = _pick_row_tile(n, jnp.dtype(sim_matrix0.dtype).itemsize)
    grid = (n // tm,)

    per_row = pl.pallas_call(
        functools.partial(dc_crossen_kernel, seta=float(seta)),
        out_shape=jax.ShapeDtypeStruct((n, 1), jnp.float32),
        grid=grid,
        in_specs=[
            pl.BlockSpec((tm, n), lambda i: (i, 0)),   # sim0 row band
            pl.BlockSpec((tm, n), lambda i: (i, 0)),   # sim1 row band
            pl.BlockSpec((1, n), lambda i: (0, 0)),    # diag0 row vec (resident)
            pl.BlockSpec((1, n), lambda i: (0, 0)),    # diag1 row vec (resident)
            pl.BlockSpec((tm, 1), lambda i: (i, 0)),   # diag0 per-row column
        ],
        out_specs=pl.BlockSpec((tm, 1), lambda i: (i, 0)),
        compiler_params=pltpu.CompilerParams(
            dimension_semantics=("parallel",),
        ),
    )(sim_matrix0, sim_matrix1, d0_row, d1_row, d0_col)

    # Tiny final reduction (N elements) stays in XLA.
    return jnp.mean(per_row)


def dc_crossen_ref(sim0, sim1, seta=0.8):
    """Pure-JAX reference mirroring the PyTorch forward."""
    diag0 = jnp.diag(sim0)
    diag1 = jnp.diag(sim1)
    s0 = sim0 - diag0[None, :]
    s1 = sim1 - diag1[None, :]
    sim = jnp.where(s1 < seta, s0, 0.0) + diag0[None, :]
    logpt = jax.nn.log_softmax(sim, axis=-1)
    return -jnp.mean(jnp.diag(logpt))


if __name__ == "__main__":
    # DC_CrossEn has no learnable parameters (empty __init__) — nothing to init.
    N = 8
    key = jax.random.PRNGKey(0)
    k0, k1 = jax.random.split(key)
    sim0 = jax.random.normal(k0, (N, N), dtype=jnp.float32)
    sim1 = jax.random.normal(k1, (N, N), dtype=jnp.float32)

    loss = dc_crossen(sim0, sim1, seta=0.8)
    loss = jax.block_until_ready(loss)

    ref = dc_crossen_ref(sim0, sim1, seta=0.8)
    if not jnp.allclose(loss, ref, atol=1e-5, rtol=1e-5):
        raise AssertionError(f"mismatch: pallas={loss} ref={ref}")

    print("KERNEL_OK")
</pallas_src>

<mosaic_0001>
module attributes {stable_mosaic.version = 11 : i64} {
  func.func @dc_crossen_kernel(%arg0: i32, %arg1: memref<8x8xf32, #tpu.memory_space<vmem>>, %arg2: memref<8x8xf32, #tpu.memory_space<vmem>>, %arg3: memref<1x8xf32, #tpu.memory_space<vmem>>, %arg4: memref<1x8xf32, #tpu.memory_space<vmem>>, %arg5: memref<8x1xf32, #tpu.memory_space<vmem>>, %arg6: memref<8x1xf32, #tpu.memory_space<vmem>>) attributes {dimension_semantics = [#tpu.dimension_semantics<parallel>], iteration_bounds = array<i64: 1>, scalar_prefetch = 0 : i64, scratch_operands = 0 : i64, tpu.core_type = #tpu.core_type<tc>, window_params = [{transform_indices = @transform_0, window_bounds = array<i64: 8, 8>}, {transform_indices = @transform_1, window_bounds = array<i64: 8, 8>}, {pipeline_mode = #tpu.pipeline_mode<synchronous>, transform_indices = @transform_2, window_bounds = array<i64: 1, 8>}, {pipeline_mode = #tpu.pipeline_mode<synchronous>, transform_indices = @transform_3, window_bounds = array<i64: 1, 8>}, {transform_indices = @transform_4, window_bounds = array<i64: 8, 1>}, {transform_indices = @transform_5, window_bounds = array<i64: 8, 1>}]} {
    %c0 = arith.constant 0 : index
    %c0_0 = arith.constant 0 : index
    %0 = vector.load %arg1[%c0, %c0_0] : memref<8x8xf32, #tpu.memory_space<vmem>>, vector<8x8xf32>
    %c0_1 = arith.constant 0 : index
    %c0_2 = arith.constant 0 : index
    %1 = vector.load %arg2[%c0_1, %c0_2] : memref<8x8xf32, #tpu.memory_space<vmem>>, vector<8x8xf32>
    %c0_3 = arith.constant 0 : index
    %c0_4 = arith.constant 0 : index
    %2 = vector.load %arg3[%c0_3, %c0_4] : memref<1x8xf32, #tpu.memory_space<vmem>>, vector<1x8xf32>
    %c0_5 = arith.constant 0 : index
    %c0_6 = arith.constant 0 : index
    %3 = vector.load %arg4[%c0_5, %c0_6] : memref<1x8xf32, #tpu.memory_space<vmem>>, vector<1x8xf32>
    %c0_7 = arith.constant 0 : index
    %c0_8 = arith.constant 0 : index
    %4 = vector.load %arg5[%c0_7, %c0_8] : memref<8x1xf32, #tpu.memory_space<vmem>>, vector<8x1xf32>
    %5 = vector.broadcast %2 : vector<1x8xf32> to vector<8x8xf32>
    %6 = arith.subf %0, %5 : vector<8x8xf32>
    %7 = vector.broadcast %3 : vector<1x8xf32> to vector<8x8xf32>
    %8 = arith.subf %1, %7 : vector<8x8xf32>
    %cst = arith.constant 8.000000e-01 : f32
    %9 = vector.broadcast %cst : f32 to vector<8x8xf32>
    %10 = arith.cmpf olt, %8, %9 : vector<8x8xf32>
    %cst_9 = arith.constant 0.000000e+00 : f32
    %11 = vector.broadcast %cst_9 : f32 to vector<8x8xf32>
    %12 = arith.select %10, %6, %11 : vector<8x8xi1>, vector<8x8xf32>
    %13 = vector.broadcast %2 : vector<1x8xf32> to vector<8x8xf32>
    %14 = arith.addf %12, %13 : vector<8x8xf32>
    %cst_10 = arith.constant dense<0xFF800000> : vector<8xf32>
    %15 = vector.multi_reduction <maximumf>, %14, %cst_10 [1] : vector<8x8xf32> to vector<8xf32>
    %16 = vector.shape_cast %15 : vector<8xf32> to vector<8x1xf32>
    %17 = vector.broadcast %16 : vector<8x1xf32> to vector<8x8xf32>
    %18 = arith.subf %14, %17 : vector<8x8xf32>
    %19 = math.exp %18 : vector<8x8xf32>
    %cst_11 = arith.constant dense<0.000000e+00> : vector<8xf32>
    %20 = vector.multi_reduction <add>, %19, %cst_11 [1] : vector<8x8xf32> to vector<8xf32>
    %21 = vector.shape_cast %20 : vector<8xf32> to vector<8x1xf32>
    %22 = math.log %21 : vector<8x1xf32>
    %23 = arith.addf %22, %16 : vector<8x1xf32>
    %24 = arith.subf %23, %4 : vector<8x1xf32>
    %c0_12 = arith.constant 0 : index
    %c0_13 = arith.constant 0 : index
    %25 = vector.load %arg6[%c0_12, %c0_13] : memref<8x1xf32, #tpu.memory_space<vmem>>, vector<8x1xf32>
    tpu.vector_store %arg6[%c0_12, %c0_13], %24 {strides = array<i32>} : memref<8x1xf32, #tpu.memory_space<vmem>>, vector<8x1xf32>,
    return
  }
  func.func @transform_0(%arg0: i32) -> (i32, i32) {
    %c0_i32 = arith.constant 0 : i32
    %c0_i32_0 = arith.constant 0 : i32
    return %arg0, %c0_i32 : i32, i32
  }
  func.func @transform_1(%arg0: i32) -> (i32, i32) {
    %c0_i32 = arith.constant 0 : i32
    %c0_i32_0 = arith.constant 0 : i32
    return %arg0, %c0_i32 : i32, i32
  }
  func.func @transform_2(%arg0: i32) -> (i32, i32) {
    %c0_i32 = arith.constant 0 : i32
    %c0_i32_0 = arith.constant 0 : i32
    %c0_i32_1 = arith.constant 0 : i32
    return %c0_i32, %c0_i32_0 : i32, i32
  }
  func.func @transform_3(%arg0: i32) -> (i32, i32) {
    %c0_i32 = arith.constant 0 : i32
    %c0_i32_0 = arith.constant 0 : i32
    %c0_i32_1 = arith.constant 0 : i32
    return %c0_i32, %c0_i32_0 : i32, i32
  }
  func.func @transform_4(%arg0: i32) -> (i32, i32) {
    %c0_i32 = arith.constant 0 : i32
    %c0_i32_0 = arith.constant 0 : i32
    return %arg0, %c0_i32 : i32, i32
  }
  func.func @transform_5(%arg0: i32) -> (i32, i32) {
    %c0_i32 = arith.constant 0 : i32
    %c0_i32_0 = arith.constant 0 : i32
    return %arg0, %c0_i32 : i32, i32
  }
}

</mosaic_0001>

<bundles_post_ra>
// kernel: tpu_custom_call.1
= control target key start
LH: loop header
LB: loop body
LE: loop exit
PB: predicated region body
PF: predicated region fallthrough
CT: control target
= control target key end

     0   :  { %10 = vsyncpa [#allocation3], 0  ;;  %s106_s18 = smov [#allocation2]   ;;  %s164_s0 = inlined_call_operand.vmem [shape: f32[8,8], index: 0, kind: input, shape index: {}]   ;;  %s165_s1 = inlined_call_operand.hbm [shape: f32[8,8], index: 1, kind: input, shape index: {}]   ;;  %s166_s2 = inlined_call_operand.vmem [shape: f32[1,8], index: 2, kind: input, shape index: {}]   ;;  %s167_s3 = inlined_call_operand.vmem [shape: f32[1,8], index: 3, kind: input, shape index: {}]   ;;  %s168_s4 = inlined_call_operand.vmem [shape: f32[8,1], index: 4, kind: input, shape index: {}]   ;;  %s169_s5 = inlined_call_operand.vmem [shape: f32[8,1], index: 5, kind: output, shape index: {}]  }
   0x1   :  { %s19_s19 = sshll.u32 %s106_s18, 4  ;;  %s82_s22 = scalar_lea.hbm %s165_s1, 128  ;;  %s20_s19 = int_to_ptr.vmem [resolvable:$true] %s19_s19 }
   0x2   :  { %p83_p0 = scmp.ne.s32.totalorder %s165_s1, %s82_s22  ;;  %p86_p1 = scmp.lt.u32.totalorder %s82_s22, %s165_s1 }
   0x4   :  { %p88_p2 = pnand %p86_p1, %p83_p0 }
   0x6   :  { %91 = shalt.err (!%p88_p2)
}
   0x7   :  { %s92_s27 = scalar_lea.vmem %s20_s19, 128  ;;  %p97_p4 = scmp.lt.s32.totalorder %s20_s19, %s20_s19 }
   0x8   :  { %p93_p3 = scmp.ne.s32.totalorder %s20_s19, %s92_s27  ;;  %p98_p5 = scmp.lt.s32.totalorder %s92_s27, %s92_s27 }
   0xa   :  { %p99_p6 = por %p98_p5, %p97_p4 }
   0xc   :  { %p100_p7 = pnand %p99_p6, %p93_p3 }
   0xe   :  { %103 = shalt.err (!%p100_p7)
}
   0xf   :  { %22 = dma.hbm_to_vmem [thread:$0]  %s165_s1, 128, %s20_s19, [#allocation3]  }
  0x10   :  { %104 = dma.done.wait [#allocation3], 128  }
  0x11   :  { %105 = vsyncadd [#allocation3], 4294967168  ;;  %v32_v0 = vld [vmem:[%s164_s0] sm:$0xff]  ;;  %vm54_vm1 = vcmask 64512   ;;  %vm68_vm2 = vcmask 7168  }
  0x12   :  { %v33_v1 = vld [vmem:[#allocation2] sm:$0xff] }
  0x13   :  { %v75_v2 = vld [vmem:[%s166_s2] ss:$0 sm:$0xff] }
  0x14   :  { %v76_v3 = vld [vmem:[%s167_s3] ss:$0 sm:$0xff]  ;;  %v43_v4 = vsub.f32 %v32_v0, %v75_v2 }
  0x15   :  { %v50_v5 = vsub.f32 %v33_v1, %v76_v3  ;;  %v36_v17 = vld [vmem:[%s168_s4] sm:$0xff] }
  0x17   :  { %vm51_vm0 = vcmp.lt.f32.partialorder %v50_v5, 0.8 }
  0x18   :  { %v52_v6 = vsel %vm51_vm0, %v43_v4, 0.0 }
  0x19   :  { %v53_v7 = vadd.f32 %v75_v2, %v52_v6 }
  0x1b   :  { %v55_v8 = vsel %vm54_vm1, %v53_v7, -inf }
  0x1c   :  { %56 = vmax.xlane.f32.xlu0 %v55_v8 }
  0xa9   :  { %v57_v9 = vpop.xlane.xlu0 %56 }
  0xaa   :  { %v58_v10 = vsub.f32 %v53_v7, %v57_v9 }
  0xac   :  { %v59_v11 = vmul.f32 1.442695, %v58_v10 }
  0xae   :  { %78 = vpow2.f32 %v59_v11 }
  0xb8   :  { %v79_v12 = vpop.eup %78 }
  0xb9   :  { %v61_v13 = vsel %vm54_vm1, %v79_v12, 0.0 }
  0xba   :  { %62 = vadd.xlane.f32.xlu0 %v61_v13 }
 0x147   :  { %v63_v14 = vpop.xlane.xlu0 %62 }
 0x148   :  { %80 = vlog2.f32 %v63_v14 }
 0x152   :  { %v81_v15 = vpop.eup %80 }
 0x153   :  { %v65_v16 = vmul.f32 0.6931472, %v81_v15 }
 0x155   :  { %v66_v18 = vadd.f32 %v65_v16, %v57_v9 }
 0x157   :  { %v67_v19 = vsub.f32 %v66_v18, %v36_v17 }
 0x159   :  { %69 = vst.msk [vmem:[%s169_s5] sm:$0xff] %vm68_vm2, %v67_v19 }
 0x15a   :  { %74 = vsyncpa [#allocation3], 1 }

</bundles_post_ra>
